<compile_context>
chip_gen: v6e
topology: v6e:2x2x1
jax: 0.10.0
libtpu: 0.0.40
codegen_flags: <defaults>
</compile_context>

<pallas_src>
import jax
import jax.numpy as jnp
from jax.experimental import pallas as pl
from jax.experimental.pallas import tpu as pltpu

_SELU_ALPHA = 1.6732632423543772
_SELU_SCALE = 1.0507009873554805
_DROPOUT_P = 0.5

_OUT_DIM = 92        # real output features of map3
_HIDDEN_PAD = 128    # hidden dim zero-padded to a full lane width
_OUT_PAD = 128       # output dim zero-padded -> unmasked lane-dense stores
_TILE_B_MAX = 512    # batch rows per grid step; well inside VMEM on v5e/v6e/v7x


def _round_up(n, m):
    return ((n + m - 1) // m) * m


def _selu_f32(x):
    return _SELU_SCALE * jnp.where(x > 0.0, x, _SELU_ALPHA * (jnp.exp(x) - 1.0))


def _generator_kernel(x_ref, w1_ref, b1_ref, w2_ref, b2_ref, w3_ref, b3_ref,
                      m1_ref, m2_ref, out_ref):
    # layer 1: Linear -> SELU -> dropout (scale folded into mask values 0.0 / 2.0)
    h = jnp.dot(x_ref[...].astype(jnp.bfloat16), w1_ref[...],
                preferred_element_type=jnp.float32) + b1_ref[...]
    h = _selu_f32(h) * m1_ref[...]

    # layer 2: Linear -> SELU -> dropout
    h = jnp.dot(h.astype(jnp.bfloat16), w2_ref[...],
                preferred_element_type=jnp.float32) + b2_ref[...]
    h = _selu_f32(h) * m2_ref[...]

    # layer 3: Linear -> ReLU
    y = jnp.dot(h.astype(jnp.bfloat16), w3_ref[...],
                preferred_element_type=jnp.float32) + b3_ref[...]
    out_ref[...] = jnp.maximum(y, 0.0)


def generator_forward(x, params, dropout_key):
    """x: (batch, noise_dim) float32. Returns (batch, 92) float32."""
    batch, noise_dim = x.shape
    assert params["w1"].shape[0] == noise_dim

    tile_b = min(_TILE_B_MAX, _round_up(batch, 16))
    batch_p = _round_up(batch, tile_b)
    grid = (batch_p // tile_b,)

    if batch_p != batch:
        x = jnp.pad(x, ((0, batch_p - batch), (0, 0)))

    # Fresh inverted-dropout masks per call (values 0.0 or 1/(1-p) = 2.0).
    k1, k2 = jax.random.split(dropout_key)
    scale = 1.0 / (1.0 - _DROPOUT_P)
    m1 = jax.random.bernoulli(k1, 1.0 - _DROPOUT_P,
                              (batch_p, _HIDDEN_PAD)).astype(jnp.float32) * scale
    m2 = jax.random.bernoulli(k2, 1.0 - _DROPOUT_P,
                              (batch_p, _HIDDEN_PAD)).astype(jnp.float32) * scale

    def row_spec(shape):
        return pl.BlockSpec(shape, lambda i: (i, 0))

    def const_spec(shape):
        return pl.BlockSpec(shape, lambda i: (0, 0))

    w1, b1 = params["w1"], params["b1"]
    w2, b2 = params["w2"], params["b2"]
    w3, b3 = params["w3"], params["b3"]

    flops = 2 * batch_p * (noise_dim * _HIDDEN_PAD
                           + _HIDDEN_PAD * _HIDDEN_PAD
                           + _HIDDEN_PAD * _OUT_PAD)
    transcendentals = 2 * batch_p * _HIDDEN_PAD
    bytes_accessed = (x.size * 4 + m1.size * 4 + m2.size * 4
                      + (w1.size + w2.size + w3.size) * 2
                      + (b1.size + b2.size + b3.size) * 4
                      + batch_p * _OUT_PAD * 4)

    y_pad = pl.pallas_call(
        _generator_kernel,
        out_shape=jax.ShapeDtypeStruct((batch_p, _OUT_PAD), jnp.float32),
        grid=grid,
        in_specs=[
            row_spec((tile_b, noise_dim)),            # x tile (pipelined)
            const_spec((noise_dim, _HIDDEN_PAD)),     # w1 (VMEM-resident)
            const_spec((1, _HIDDEN_PAD)),             # b1
            const_spec((_HIDDEN_PAD, _HIDDEN_PAD)),   # w2
            const_spec((1, _HIDDEN_PAD)),             # b2
            const_spec((_HIDDEN_PAD, _OUT_PAD)),      # w3
            const_spec((1, _OUT_PAD)),                # b3
            row_spec((tile_b, _HIDDEN_PAD)),          # dropout mask layer 1
            row_spec((tile_b, _HIDDEN_PAD)),          # dropout mask layer 2
        ],
        out_specs=row_spec((tile_b, _OUT_PAD)),
        compiler_params=pltpu.CompilerParams(
            dimension_semantics=("parallel",)),
        cost_estimate=pl.CostEstimate(
            flops=flops,
            transcendentals=transcendentals,
            bytes_accessed=bytes_accessed),
    )(x, w1, b1, w2, b2, w3, b3, m1, m2)

    return y_pad[:batch, :_OUT_DIM]


def init_params(key, noise_dim, hidden_size, out_dim=_OUT_DIM):
    """PyTorch-style Linear init. Weights stored as (in, out) = W_pt.T,
    zero-padded to lane-dense shapes; weights bf16, biases f32."""
    assert hidden_size <= _HIDDEN_PAD and out_dim <= _OUT_PAD
    ks = jax.random.split(key, 6)

    def lin(kw, kb, fan_in, fan_out, pad_in, pad_out):
        bound = 1.0 / jnp.sqrt(fan_in)
        w = jax.random.uniform(kw, (fan_in, fan_out), jnp.float32, -bound, bound)
        b = jax.random.uniform(kb, (1, fan_out), jnp.float32, -bound, bound)
        w = jnp.pad(w, ((0, pad_in - fan_in), (0, pad_out - fan_out)))
        b = jnp.pad(b, ((0, 0), (0, pad_out - fan_out)))
        return w.astype(jnp.bfloat16), b

    w1, b1 = lin(ks[0], ks[1], noise_dim, hidden_size, noise_dim, _HIDDEN_PAD)
    w2, b2 = lin(ks[2], ks[3], hidden_size, hidden_size, _HIDDEN_PAD, _HIDDEN_PAD)
    w3, b3 = lin(ks[4], ks[5], hidden_size, out_dim, _HIDDEN_PAD, _OUT_PAD)
    return {"w1": w1, "b1": b1, "w2": w2, "b2": b2, "w3": w3, "b3": b3}


if __name__ == "__main__":
    noise_dim = 16
    hidden_size = 32
    batch = 8

    key = jax.random.PRNGKey(0)
    kx, kp, kd = jax.random.split(key, 3)

    x = jax.random.normal(kx, (batch, noise_dim), dtype=jnp.float32)
    params = init_params(kp, noise_dim, hidden_size)

    y = generator_forward(x, params, kd)
    y = jax.block_until_ready(y)

    assert y.shape == (batch, _OUT_DIM)
    assert bool(jnp.all(y >= 0.0))          # ReLU output is non-negative
    assert bool(jnp.all(jnp.isfinite(y)))
    print("KERNEL_OK")
</pallas_src>

<mosaic_0001>
module attributes {stable_mosaic.version = 11 : i64} {
  func.func @_generator_kernel(%arg0: i32, %arg1: memref<16x16xf32, #tpu.memory_space<vmem>>, %arg2: memref<16x128xbf16, #tpu.memory_space<vmem>>, %arg3: memref<1x128xf32, #tpu.memory_space<vmem>>, %arg4: memref<128x128xbf16, #tpu.memory_space<vmem>>, %arg5: memref<1x128xf32, #tpu.memory_space<vmem>>, %arg6: memref<128x128xbf16, #tpu.memory_space<vmem>>, %arg7: memref<1x128xf32, #tpu.memory_space<vmem>>, %arg8: memref<16x128xf32, #tpu.memory_space<vmem>>, %arg9: memref<16x128xf32, #tpu.memory_space<vmem>>, %arg10: memref<16x128xf32, #tpu.memory_space<vmem>>) attributes {dimension_semantics = [#tpu.dimension_semantics<parallel>], iteration_bounds = array<i64: 1>, scalar_prefetch = 0 : i64, scratch_operands = 0 : i64, tpu.core_type = #tpu.core_type<tc>, window_params = [{transform_indices = @transform_0, window_bounds = array<i64: 16, 16>}, {pipeline_mode = #tpu.pipeline_mode<synchronous>, transform_indices = @transform_1, window_bounds = array<i64: 16, 128>}, {pipeline_mode = #tpu.pipeline_mode<synchronous>, transform_indices = @transform_2, window_bounds = array<i64: 1, 128>}, {pipeline_mode = #tpu.pipeline_mode<synchronous>, transform_indices = @transform_3, window_bounds = array<i64: 128, 128>}, {pipeline_mode = #tpu.pipeline_mode<synchronous>, transform_indices = @transform_4, window_bounds = array<i64: 1, 128>}, {pipeline_mode = #tpu.pipeline_mode<synchronous>, transform_indices = @transform_5, window_bounds = array<i64: 128, 128>}, {pipeline_mode = #tpu.pipeline_mode<synchronous>, transform_indices = @transform_6, window_bounds = array<i64: 1, 128>}, {transform_indices = @transform_7, window_bounds = array<i64: 16, 128>}, {transform_indices = @transform_8, window_bounds = array<i64: 16, 128>}, {transform_indices = @transform_9, window_bounds = array<i64: 16, 128>}]} {
    %c0 = arith.constant 0 : index
    %c0_0 = arith.constant 0 : index
    %0 = vector.load %arg1[%c0, %c0_0] : memref<16x16xf32, #tpu.memory_space<vmem>>, vector<16x16xf32>
    %1 = arith.truncf %0 : vector<16x16xf32> to vector<16x16xbf16>
    %c0_1 = arith.constant 0 : index
    %c0_2 = arith.constant 0 : index
    %2 = vector.load %arg2[%c0_1, %c0_2] : memref<16x128xbf16, #tpu.memory_space<vmem>>, vector<16x128xbf16>
    %cst = arith.constant dense<0.000000e+00> : vector<16x128xf32>
    %3 = tpu.matmul %1, %2, %cst {dimension_numbers = #tpu.dot_dimension_numbers<[1], [0], [0], [1], [0, 0, 1, 1], [], []>} : vector<16x16xbf16>, vector<16x128xbf16>, vector<16x128xf32> -> vector<16x128xf32>
    %c0_3 = arith.constant 0 : index
    %c0_4 = arith.constant 0 : index
    %4 = vector.load %arg3[%c0_3, %c0_4] : memref<1x128xf32, #tpu.memory_space<vmem>>, vector<1x128xf32>
    %5 = vector.broadcast %4 : vector<1x128xf32> to vector<16x128xf32>
    %6 = arith.addf %3, %5 : vector<16x128xf32>
    %cst_5 = arith.constant 0.000000e+00 : f32
    %7 = vector.broadcast %cst_5 : f32 to vector<16x128xf32>
    %8 = arith.cmpf ogt, %6, %7 : vector<16x128xf32>
    %9 = math.exp %6 : vector<16x128xf32>
    %cst_6 = arith.constant 1.000000e+00 : f32
    %10 = vector.broadcast %cst_6 : f32 to vector<16x128xf32>
    %11 = arith.subf %9, %10 : vector<16x128xf32>
    %cst_7 = arith.constant 1.67326319 : f32
    %12 = vector.broadcast %cst_7 : f32 to vector<16x128xf32>
    %13 = arith.mulf %12, %11 : vector<16x128xf32>
    %14 = arith.select %8, %6, %13 : vector<16x128xi1>, vector<16x128xf32>
    %cst_8 = arith.constant 1.05070102 : f32
    %15 = vector.broadcast %cst_8 : f32 to vector<16x128xf32>
    %16 = arith.mulf %15, %14 : vector<16x128xf32>
    %c0_9 = arith.constant 0 : index
    %c0_10 = arith.constant 0 : index
    %17 = vector.load %arg8[%c0_9, %c0_10] : memref<16x128xf32, #tpu.memory_space<vmem>>, vector<16x128xf32>
    %18 = arith.mulf %16, %17 : vector<16x128xf32>
    %19 = arith.truncf %18 : vector<16x128xf32> to vector<16x128xbf16>
    %c0_11 = arith.constant 0 : index
    %c0_12 = arith.constant 0 : index
    %20 = vector.load %arg4[%c0_11, %c0_12] : memref<128x128xbf16, #tpu.memory_space<vmem>>, vector<128x128xbf16>
    %cst_13 = arith.constant dense<0.000000e+00> : vector<16x128xf32>
    %21 = tpu.matmul %19, %20, %cst_13 {dimension_numbers = #tpu.dot_dimension_numbers<[1], [0], [0], [1], [0, 0, 1, 1], [], []>} : vector<16x128xbf16>, vector<128x128xbf16>, vector<16x128xf32> -> vector<16x128xf32>
    %c0_14 = arith.constant 0 : index
    %c0_15 = arith.constant 0 : index
    %22 = vector.load %arg5[%c0_14, %c0_15] : memref<1x128xf32, #tpu.memory_space<vmem>>, vector<1x128xf32>
    %23 = vector.broadcast %22 : vector<1x128xf32> to vector<16x128xf32>
    %24 = arith.addf %21, %23 : vector<16x128xf32>
    %cst_16 = arith.constant 0.000000e+00 : f32
    %25 = vector.broadcast %cst_16 : f32 to vector<16x128xf32>
    %26 = arith.cmpf ogt, %24, %25 : vector<16x128xf32>
    %27 = math.exp %24 : vector<16x128xf32>
    %cst_17 = arith.constant 1.000000e+00 : f32
    %28 = vector.broadcast %cst_17 : f32 to vector<16x128xf32>
    %29 = arith.subf %27, %28 : vector<16x128xf32>
    %cst_18 = arith.constant 1.67326319 : f32
    %30 = vector.broadcast %cst_18 : f32 to vector<16x128xf32>
    %31 = arith.mulf %30, %29 : vector<16x128xf32>
    %32 = arith.select %26, %24, %31 : vector<16x128xi1>, vector<16x128xf32>
    %cst_19 = arith.constant 1.05070102 : f32
    %33 = vector.broadcast %cst_19 : f32 to vector<16x128xf32>
    %34 = arith.mulf %33, %32 : vector<16x128xf32>
    %c0_20 = arith.constant 0 : index
    %c0_21 = arith.constant 0 : index
    %35 = vector.load %arg9[%c0_20, %c0_21] : memref<16x128xf32, #tpu.memory_space<vmem>>, vector<16x128xf32>
    %36 = arith.mulf %34, %35 : vector<16x128xf32>
    %37 = arith.truncf %36 : vector<16x128xf32> to vector<16x128xbf16>
    %c0_22 = arith.constant 0 : index
    %c0_23 = arith.constant 0 : index
    %38 = vector.load %arg6[%c0_22, %c0_23] : memref<128x128xbf16, #tpu.memory_space<vmem>>, vector<128x128xbf16>
    %cst_24 = arith.constant dense<0.000000e+00> : vector<16x128xf32>
    %39 = tpu.matmul %37, %38, %cst_24 {dimension_numbers = #tpu.dot_dimension_numbers<[1], [0], [0], [1], [0, 0, 1, 1], [], []>} : vector<16x128xbf16>, vector<128x128xbf16>, vector<16x128xf32> -> vector<16x128xf32>
    %c0_25 = arith.constant 0 : index
    %c0_26 = arith.constant 0 : index
    %40 = vector.load %arg7[%c0_25, %c0_26] : memref<1x128xf32, #tpu.memory_space<vmem>>, vector<1x128xf32>
    %41 = vector.broadcast %40 : vector<1x128xf32> to vector<16x128xf32>
    %42 = arith.addf %39, %41 : vector<16x128xf32>
    %cst_27 = arith.constant 0.000000e+00 : f32
    %43 = vector.broadcast %cst_27 : f32 to vector<16x128xf32>
    %44 = arith.maximumf %42, %43 : vector<16x128xf32>
    %c0_28 = arith.constant 0 : index
    %c0_29 = arith.constant 0 : index
    %45 = vector.load %arg10[%c0_28, %c0_29] : memref<16x128xf32, #tpu.memory_space<vmem>>, vector<16x128xf32>
    tpu.vector_store %arg10[%c0_28, %c0_29], %44 {strides = array<i32>} : memref<16x128xf32, #tpu.memory_space<vmem>>, vector<16x128xf32>,
    return
  }
  func.func @transform_0(%arg0: i32) -> (i32, i32) {
    %c0_i32 = arith.constant 0 : i32
    %c0_i32_0 = arith.constant 0 : i32
    return %arg0, %c0_i32 : i32, i32
  }
  func.func @transform_1(%arg0: i32) -> (i32, i32) {
    %c0_i32 = arith.constant 0 : i32
    %c0_i32_0 = arith.constant 0 : i32
    %c0_i32_1 = arith.constant 0 : i32
    return %c0_i32, %c0_i32_0 : i32, i32
  }
  func.func @transform_2(%arg0: i32) -> (i32, i32) {
    %c0_i32 = arith.constant 0 : i32
    %c0_i32_0 = arith.constant 0 : i32
    %c0_i32_1 = arith.constant 0 : i32
    return %c0_i32, %c0_i32_0 : i32, i32
  }
  func.func @transform_3(%arg0: i32) -> (i32, i32) {
    %c0_i32 = arith.constant 0 : i32
    %c0_i32_0 = arith.constant 0 : i32
    %c0_i32_1 = arith.constant 0 : i32
    return %c0_i32, %c0_i32_0 : i32, i32
  }
  func.func @transform_4(%arg0: i32) -> (i32, i32) {
    %c0_i32 = arith.constant 0 : i32
    %c0_i32_0 = arith.constant 0 : i32
    %c0_i32_1 = arith.constant 0 : i32
    return %c0_i32, %c0_i32_0 : i32, i32
  }
  func.func @transform_5(%arg0: i32) -> (i32, i32) {
    %c0_i32 = arith.constant 0 : i32
    %c0_i32_0 = arith.constant 0 : i32
    %c0_i32_1 = arith.constant 0 : i32
    return %c0_i32, %c0_i32_0 : i32, i32
  }
  func.func @transform_6(%arg0: i32) -> (i32, i32) {
    %c0_i32 = arith.constant 0 : i32
    %c0_i32_0 = arith.constant 0 : i32
    %c0_i32_1 = arith.constant 0 : i32
    return %c0_i32, %c0_i32_0 : i32, i32
  }
  func.func @transform_7(%arg0: i32) -> (i32, i32) {
    %c0_i32 = arith.constant 0 : i32
    %c0_i32_0 = arith.constant 0 : i32
    return %arg0, %c0_i32 : i32, i32
  }
  func.func @transform_8(%arg0: i32) -> (i32, i32) {
    %c0_i32 = arith.constant 0 : i32
    %c0_i32_0 = arith.constant 0 : i32
    return %arg0, %c0_i32 : i32, i32
  }
  func.func @transform_9(%arg0: i32) -> (i32, i32) {
    %c0_i32 = arith.constant 0 : i32
    %c0_i32_0 = arith.constant 0 : i32
    return %arg0, %c0_i32 : i32, i32
  }
}

</mosaic_0001>

<bundles_post_ra>
// kernel: tpu_custom_call.1
= control target key start
LH: loop header
LB: loop body
LE: loop exit
PB: predicated region body
PF: predicated region fallthrough
CT: control target
= control target key end

     0   :  { %14 = vsyncpa [#allocation3], 0  ;;  %s878_s0 = inlined_call_operand.hbm [shape: f32[16,16], index: 0, kind: input, shape index: {}]   ;;  %s879_s1 = inlined_call_operand.hbm [shape: bf16[16,128], index: 1, kind: input, shape index: {}]   ;;  %s880_s2 = inlined_call_operand.vmem [shape: f32[1,128], index: 2, kind: input, shape index: {}]   ;;  %s881_s3 = inlined_call_operand.hbm [shape: bf16[128,128], index: 3, kind: input, shape index: {}]   ;;  %s882_s4 = inlined_call_operand.vmem [shape: f32[1,128], index: 4, kind: input, shape index: {}]   ;;  %s883_s5 = inlined_call_operand.hbm [shape: bf16[128,128], index: 5, kind: input, shape index: {}]   ;;  %s884_s6 = inlined_call_operand.vmem [shape: f32[1,128], index: 6, kind: input, shape index: {}]   ;;  %s885_s7 = inlined_call_operand.hbm [shape: f32[16,128], index: 7, kind: input, shape index: {}]   ;;  %s886_s8 = inlined_call_operand.hbm [shape: f32[16,128], index: 8, kind: input, shape index: {}]   ;;  %s887_s9 = inlined_call_operand.hbm [shape: f32[16,128], index: 9, kind: output, shape index: {}]  }
   0x1   :  { %15 = vsyncpa [#allocation6], 0 }
   0x2   :  { %16 = vsyncpa [#allocation9], 0 }
   0x3   :  { %17 = vsyncpa [#allocation12], 0 }
   0x4   :  { %18 = vsyncpa [#allocation4], 0  ;;  %s744_s30 = smov [#allocation5]  }
   0x5   :  { %s36_s10 = sshll.u32 %s744_s30, 4  ;;  %s37_s10 = int_to_ptr.vmem [resolvable:$true] %s36_s10 }
   0x6   :  { %s602_s11 = scalar_lea.vmem %s37_s10, 128  ;;  %p607_p1 = scmp.lt.s32.totalorder %s37_s10, %s37_s10 }
   0x7   :  { %p603_p0 = scmp.ne.s32.totalorder %s37_s10, %s602_s11  ;;  %p608_p2 = scmp.lt.s32.totalorder %s602_s11, %s602_s11 }
   0x9   :  { %p609_p3 = por %p608_p2, %p607_p1 }
   0xb   :  { %p610_p4 = pnand %p609_p3, %p603_p0 }
   0xd   :  { %613 = shalt.err (!%p610_p4)
}
   0xe   :  { %s745_s12 = smov 64   ;;  %s746_s13 = smov 4  }
   0xf   :  { %42 = dma.hbm_to_vmem [thread:$0]  %s879_s1, 128, %s37_s10, [#allocation6], %s745_s12, %s745_s12, %s746_s13  }
  0x10   :  { %s747_s16 = smov [#allocation8]   ;;  %s748_s18 = smov [#allocation2]  }
  0x11   :  { %s64_s17 = sshll.u32 %s747_s16, 4  ;;  %s24_s19 = sshll.u32 %s748_s18, 4  ;;  %s65_s17 = int_to_ptr.vmem [resolvable:$true] %s64_s17  ;;  %s25_s19 = int_to_ptr.vmem [resolvable:$true] %s24_s19 }
  0x12   :  { %s622_s20 = scalar_lea.vmem %s65_s17, 1024  ;;  %p627_p6 = scmp.lt.s32.totalorder %s65_s17, %s65_s17 }
  0x13   :  { %p623_p5 = scmp.ne.s32.totalorder %s65_s17, %s622_s20  ;;  %p628_p7 = scmp.lt.s32.totalorder %s622_s20, %s622_s20 }
  0x15   :  { %p629_p8 = por %p628_p7, %p627_p6 }
  0x17   :  { %p630_p9 = pnand %p629_p8, %p623_p5 }
  0x19   :  { %633 = shalt.err (!%p630_p9)
}
  0x1a   :  { %70 = dma.hbm_to_vmem [thread:$0]  %s883_s5, 1024, %s65_s17, [#allocation9], %s745_s12, %s745_s12, %s746_s13  }
  0x1b   :  { %s642_s1 = scalar_lea.vmem %s25_s19, 256  ;;  %p647_p11 = scmp.lt.s32.totalorder %s25_s19, %s25_s19 }
  0x1c   :  { %p643_p10 = scmp.ne.s32.totalorder %s25_s19, %s642_s1  ;;  %p648_p12 = scmp.lt.s32.totalorder %s642_s1, %s642_s1 }
  0x1e   :  { %p649_p13 = por %p648_p12, %p647_p11 }
  0x20   :  { %p650_p0 = pnand %p649_p13, %p643_p10 }
  0x22   :  { %653 = shalt.err (!%p650_p0)
}
  0x23   :  { %s749_s23 = smov 128   ;;  %s750_s24 = smov 8  }
  0x24   :  { %30 = dma.hbm_to_vmem [thread:$0]  %s878_s0, 256, %s25_s19, [#allocation3], %s749_s23, %s749_s23, %s750_s24  }
  0x25   :  { %s751_s27 = smov [#allocation7]   ;;  %s752_s5 = smov [#allocation10]  }
  0x26   :  { %s50_s28 = sshll.u32 %s751_s27, 4  ;;  %s78_s29 = sshll.u32 %s752_s5, 4  ;;  %s51_s28 = int_to_ptr.vmem [resolvable:$true] %s50_s28  ;;  %s79_s29 = int_to_ptr.vmem [resolvable:$true] %s78_s29 }
  0x27   :  { %s662_s30 = scalar_lea.vmem %s51_s28, 1024  ;;  %p667_p2 = scmp.lt.s32.totalorder %s51_s28, %s51_s28 }
  0x28   :  { %p663_p1 = scmp.ne.s32.totalorder %s51_s28, %s662_s30  ;;  %p668_p3 = scmp.lt.s32.totalorder %s662_s30, %s662_s30 }
  0x2a   :  { %p669_p4 = por %p668_p3, %p667_p2 }
  0x2c   :  { %p670_p5 = pnand %p669_p4, %p663_p1 }
  0x2e   :  { %673 = shalt.err (!%p670_p5)
}
  0x2f   :  { %56 = dma.hbm_to_vmem [thread:$0]  %s881_s3, 1024, %s51_s28, [#allocation6], %s745_s12, %s745_s12, %s746_s13  }
  0x30   :  { %s682_s0 = scalar_lea.vmem %s79_s29, 256  ;;  %p687_p7 = scmp.lt.s32.totalorder %s79_s29, %s79_s29 }
  0x31   :  { %p683_p6 = scmp.ne.s32.totalorder %s79_s29, %s682_s0  ;;  %p688_p8 = scmp.lt.s32.totalorder %s682_s0, %s682_s0 }
  0x33   :  { %p689_p9 = por %p688_p8, %p687_p7 }
  0x35   :  { %p690_p10 = pnand %p689_p9, %p683_p6 }
  0x37   :  { %693 = shalt.err (!%p690_p10)
}
  0x38   :  { %84 = dma.hbm_to_vmem [thread:$0]  %s885_s7, 256, %s79_s29, [#allocation9], %s749_s23, %s749_s23, %s750_s24  }
  0x39   :  { %s753_s16 = smov [#allocation11]  }
  0x3a   :  { %s90_s17 = sshll.u32 %s753_s16, 4  ;;  %s91_s17 = int_to_ptr.vmem [resolvable:$true] %s90_s17 }
  0x3b   :  { %s702_s18 = scalar_lea.vmem %s91_s17, 256  ;;  %p707_p12 = scmp.lt.s32.totalorder %s91_s17, %s91_s17 }
  0x3c   :  { %p703_p11 = scmp.ne.s32.totalorder %s91_s17, %s702_s18  ;;  %p708_p13 = scmp.lt.s32.totalorder %s702_s18, %s702_s18 }
  0x3e   :  { %p709_p0 = por %p708_p13, %p707_p12 }
  0x40   :  { %p710_p1 = pnand %p709_p0, %p703_p11 }
  0x42   :  { %713 = shalt.err (!%p710_p1)
}
  0x43   :  { %96 = dma.hbm_to_vmem [thread:$0]  %s886_s8, 256, %s91_s17, [#allocation12], %s749_s23, %s749_s23, %s750_s24  }
  0x44   :  { %734 = dma.done.wait [#allocation3], 256  }
  0x45   :  { %735 = vsyncadd [#allocation3], 4294967040 }
  0x46   :  { %736 = dma.done.wait [#allocation6], 1152  }
  0x47   :  { %737 = vsyncadd [#allocation6], 4294966144 }
  0x48   :  { %738 = dma.done.wait [#allocation9], 1280  }
  0x49   :  { %739 = vsyncadd [#allocation9], 4294966016 }
  0x4a   :  { %740 = dma.done.wait [#allocation12], 256  }
  0x4b   :  { %741 = vsyncadd [#allocation12], 4294967040  ;;  %v754_v0 = vmov 0.0   ;;  %vm755_vm0 = vmmov 0   ;;  %v569_v1 = vld [vmem:[#allocation5] sm:$0xff]   ;;  %v116_v2 = vld [vmem:[#allocation2] sm:$0xff] }
  0x4c   :  { %510 = vmatprep.subr.bf16.mxu0 %v754_v0  ;;  %512 = vmatprep.mubr.msk.bf16.mxu0 %vm755_vm0, %v754_v0  ;;  %v117_v3 = vld [vmem:[#allocation2 + $0x8] sm:$0xff]  ;;  %vm134_vm1 = vcmask 130048   ;;  %v570_v5 = vld [vmem:[#allocation7 + $0x38] sm:$0xff]   ;;  %v572_v7 = vld [vmem:[#allocation7 + $0x28] sm:$0xff]   ;;  %s756_s20 = smov [#allocation13]  }
  0x4d   :  { %516 = vmatprep.subr.bf16.mxu1 %v754_v0  ;;  %532 = vmatprep.mubr.msk.bf16.mxu1 %vm755_vm0, %v754_v0  ;;  %v118_v4 = vpack.c.bf16 %v117_v3, %v116_v2  ;;  %v571_v6 = vld [vmem:[#allocation7 + $0x30] sm:$0xff]   ;;  %v573_v8 = vld [vmem:[#allocation7 + $0x20] sm:$0xff]   ;;  %v574_v9 = vld [vmem:[#allocation7 + $0x18] sm:$0xff]   ;;  %s450_s21 = sshll.u32 %s756_s20, 4  ;;  %s451_s21 = int_to_ptr.vmem [resolvable:$true] %s450_s21 }
  0x4e   :  { %511 = vmatpush3.bf16.msra.mxu0 %v569_v1  ;;  %517 = vmatpush3.bf16.msra.mxu1 %v570_v5  ;;  %v575_v10 = vld [vmem:[#allocation7 + $0x10] sm:$0xff]   ;;  %v576_v11 = vld [vmem:[#allocation7 + $0x8] sm:$0xff]   ;;  %v577_v12 = vld [vmem:[#allocation7] sm:$0xff]   ;;  %s714_s22 = scalar_lea.vmem %s451_s21, 256  ;;  %p719_p3 = scmp.lt.s32.totalorder %s451_s21, %s451_s21 }
  0x4f   :  { %536 = vmatprep.subr.bf16.mxu0 %v754_v0  ;;  %518 = vmatprep.subr.bf16.mxu1 %v754_v0  ;;  %v465_v13 = vld [vmem:[%s880_s2] ss:$0 sm:$0xff]  ;;  %v193_v31 = vld [vmem:[#allocation10] sm:$0xff]  ;;  %v578_v37 = vld [vmem:[#allocation8 + $0x38] sm:$0xff]   ;;  %p715_p2 = scmp.ne.s32.totalorder %s451_s21, %s714_s22  ;;  %p720_p4 = scmp.lt.s32.totalorder %s714_s22, %s714_s22 }
  0x50   :  { %v194_v32 = vld [vmem:[#allocation10 + $0x8] sm:$0xff]  ;;  %v579_v38 = vld [vmem:[#allocation8 + $0x30] sm:$0xff]   ;;  %v581_v40 = vld [vmem:[#allocation8 + $0x20] sm:$0xff]  }
  0x51   :  { %513 = vmatmul.mubr.msk.bf16.vlgmr.msra.gmra.mxu0 %vm134_vm1, %v118_v4  ;;  %v580_v39 = vld [vmem:[#allocation8 + $0x28] sm:$0xff]   ;;  %v582_v41 = vld [vmem:[#allocation8 + $0x18] sm:$0xff]   ;;  %v583_v42 = vld [vmem:[#allocation8 + $0x10] sm:$0xff]   ;;  %p721_p5 = por %p720_p4, %p719_p3 }
  0x52   :  { %552 = vmatprep.mubr.msk.bf16.mxu0 %vm755_vm0, %v754_v0  ;;  %519 = vmatpush3.bf16.msra.mxu1 %v571_v6  ;;  %v584_v43 = vld [vmem:[#allocation8 + $0x8] sm:$0xff]   ;;  %v585_v44 = vld [vmem:[#allocation8] sm:$0xff]   ;;  %v324_v62 = vld [vmem:[#allocation11] sm:$0xff] }
  0x53   :  { %520 = vmatprep.subr.bf16.mxu1 %v754_v0  ;;  %537 = vmatpush3.bf16.msra.mxu0 %v578_v37  ;;  %v470_v45 = vld [vmem:[%s882_s4] ss:$0 sm:$0xff]  ;;  %p722_p6 = pnand %p721_p5, %p715_p2 }
  0x54   :  { %538 = vmatprep.subr.bf16.mxu0 %v754_v0  ;;  %v481_v5 = vld [vmem:[%s884_s6] ss:$0 sm:$0xff] }
  0x56   :  { %521 = vmatpush3.bf16.msra.mxu1 %v572_v7 }
  0x57   :  { %522 = vmatprep.subr.bf16.mxu1 %v754_v0  ;;  %539 = vmatpush3.bf16.msra.mxu0 %v579_v38 }
  0x58   :  { %540 = vmatprep.subr.bf16.mxu0 %v754_v0 }
  0x5a   :  { %523 = vmatpush3.bf16.msra.mxu1 %v573_v8 }
  0x5b   :  { %524 = vmatprep.subr.bf16.mxu1 %v754_v0  ;;  %541 = vmatpush3.bf16.msra.mxu0 %v580_v39 }
  0x5c   :  { %542 = vmatprep.subr.bf16.mxu0 %v754_v0 }
  0x5e   :  { %525 = vmatpush3.bf16.msra.mxu1 %v574_v9 }
  0x5f   :  { %526 = vmatprep.subr.bf16.mxu1 %v754_v0  ;;  %543 = vmatpush3.bf16.msra.mxu0 %v581_v40 }
  0x60   :  { %544 = vmatprep.subr.bf16.mxu0 %v754_v0 }
  0x62   :  { %527 = vmatpush3.bf16.msra.mxu1 %v575_v10 }
  0x63   :  { %528 = vmatprep.subr.bf16.mxu1 %v754_v0  ;;  %545 = vmatpush3.bf16.msra.mxu0 %v582_v41 }
  0x64   :  { %546 = vmatprep.subr.bf16.mxu0 %v754_v0 }
  0x66   :  { %529 = vmatpush3.bf16.msra.mxu1 %v576_v11 }
  0x67   :  { %530 = vmatprep.subr.bf16.mxu1 %v754_v0  ;;  %547 = vmatpush3.bf16.msra.mxu0 %v583_v42 }
  0x68   :  { %548 = vmatprep.subr.bf16.mxu0 %v754_v0 }
  0x6a   :  { %531 = vmatpush3.bf16.msra.mxu1 %v577_v12 }
  0x6b   :  { %549 = vmatpush3.bf16.msra.mxu0 %v584_v43 }
  0x6c   :  { %550 = vmatprep.subr.bf16.mxu0 %v754_v0  ;;  %v325_v0 = vld [vmem:[#allocation11 + $0x8] sm:$0xff] }
  0x6f   :  { %551 = vmatpush3.bf16.msra.mxu0 %v585_v44 }
 0x111   :  { %v172_v14 = vpop.f32.mrf.mxu0 }
 0x112   :  { %v173_v15 = vadd.f32 %v465_v13, %v172_v14 }
 0x113   :  { %v514_v16 = vpop.f32.mrf.mxu0 }
 0x114   :  { %v181_v17 = vmul.f32 1.442695, %v173_v15  ;;  %vm179_vm2 = vcmp.gt.f32.partialorder %v173_v15, 0.0 }
 0x115   :  { %v175_v18 = vpop.f32.mrf.mxu0 }
 0x116   :  { %586 = vpow2.f32 %v181_v17  ;;  %v176_v19 = vadd.f32 %v465_v13, %v175_v18 }
 0x117   :  { %v515_v20 = vpop.f32.mrf.mxu0 }
 0x118   :  { %v183_v21 = vmul.f32 1.442695, %v176_v19  ;;  %vm180_vm3 = vcmp.gt.f32.partialorder %v176_v19, 0.0 }
 0x11a   :  { %588 = vpow2.f32 %v183_v21 }
 0x123   :  { %v587_v22 = vpop.eup %586 }
 0x124   :  { %v468_v23 = vadd.f32 -1.0, %v587_v22 }
 0x126   :  { %v187_v24 = vmul.f32 1.6732632, %v468_v23 }
 0x127   :  { %v589_v25 = vpop.eup %588 }
 0x128   :  { %v189_v26 = vsel %vm179_vm2, %v173_v15, %v187_v24  ;;  %v469_v27 = vadd.f32 -1.0, %v589_v25 }
 0x129   :  { %v191_v29 = vmul.f32 1.050701, %v189_v26 }
 0x12a   :  { %v188_v28 = vmul.f32 1.6732632, %v469_v27 }
 0x12b   :  { %v195_v34 = vmul.f32 %v193_v31, %v191_v29 }
 0x12c   :  { %v190_v30 = vsel %vm180_vm3, %v176_v19, %v188_v28 }
 0x12d   :  { %v192_v33 = vmul.f32 1.050701, %v190_v30 }
 0x12f   :  { %v196_v35 = vmul.f32 %v194_v32, %v192_v33 }
 0x131   :  { %v197_v36 = vpack.c.bf16 %v196_v35, %v195_v34 }
 0x133   :  { %533 = vmatmul.mubr.bf16.vlgmr.msra.gmra.mxu1 %v197_v36 }
 0x1f3   :  { %v303_v46 = vpop.f32.mrf.mxu1 }
 0x1f4   :  { %v304_v47 = vadd.f32 %v470_v45, %v303_v46 }
 0x1f5   :  { %v534_v48 = vpop.f32.mrf.mxu1 }
 0x1f6   :  { %v312_v49 = vmul.f32 1.442695, %v304_v47  ;;  %vm310_vm4 = vcmp.gt.f32.partialorder %v304_v47, 0.0 }
 0x1f7   :  { %v306_v50 = vpop.f32.mrf.mxu1 }
 0x1f8   :  { %590 = vpow2.f32 %v312_v49  ;;  %v307_v51 = vadd.f32 %v470_v45, %v306_v50 }
 0x1f9   :  { %v535_v52 = vpop.f32.mrf.mxu1 }
 0x1fa   :  { %v314_v53 = vmul.f32 1.442695, %v307_v51  ;;  %vm311_vm5 = vcmp.gt.f32.partialorder %v307_v51, 0.0 }
 0x1fc   :  { %592 = vpow2.f32 %v314_v53 }
 0x205   :  { %v591_v54 = vpop.eup %590 }
 0x206   :  { %v479_v55 = vadd.f32 -1.0, %v591_v54 }
 0x208   :  { %v318_v56 = vmul.f32 1.6732632, %v479_v55 }
 0x209   :  { %v593_v57 = vpop.eup %592 }
 0x20a   :  { %v320_v58 = vsel %vm310_vm4, %v304_v47, %v318_v56  ;;  %v480_v59 = vadd.f32 -1.0, %v593_v57 }
 0x20b   :  { %v322_v61 = vmul.f32 1.050701, %v320_v58 }
 0x20c   :  { %v319_v60 = vmul.f32 1.6732632, %v480_v59 }
 0x20d   :  { %v326_v2 = vmul.f32 %v324_v62, %v322_v61 }
 0x20e   :  { %v321_v63 = vsel %vm311_vm5, %v307_v51, %v319_v60 }
 0x20f   :  { %v323_v1 = vmul.f32 1.050701, %v321_v63 }
 0x211   :  { %v327_v3 = vmul.f32 %v325_v0, %v323_v1 }
 0x213   :  { %v328_v4 = vpack.c.bf16 %v327_v3, %v326_v2 }
 0x215   :  { %553 = vmatmul.mubr.bf16.vlgmr.msra.gmra.mxu0 %v328_v4 }
 0x2d5   :  { %v434_v6 = vpop.f32.mrf.mxu0 }
 0x2d6   :  { %v435_v7 = vadd.f32 %v481_v5, %v434_v6 }
 0x2d7   :  { %v554_v8 = vpop.f32.mrf.mxu0 }
 0x2d8   :  { %v441_v9 = vmax.f32 %v435_v7, 0.0 }
 0x2d9   :  { %v437_v10 = vpop.f32.mrf.mxu0 }
 0x2da   :  { %443 = vst [vmem:[#allocation13] sm:$0xff] %v441_v9  ;;  %v438_v11 = vadd.f32 %v481_v5, %v437_v10 }
 0x2db   :  { %v555_v12 = vpop.f32.mrf.mxu0 }
 0x2dc   :  { %v442_v13 = vmax.f32 %v438_v11, 0.0 }
 0x2de   :  { %444 = vst [vmem:[#allocation13 + $0x8] sm:$0xff] %v442_v13 }
 0x2df   :  { %725 = shalt.err (!%p722_p6)
}
 0x2e0   :  { %456 = dma.vmem_to_hbm [thread:$0]  %s451_s21, 256, %s887_s9, [#allocation4], %s749_s23, %s749_s23, %s750_s24  }
 0x2e1   :  { %742 = dma.done.wait [#allocation4], 256  }
 0x2e2   :  { %743 = vsyncadd [#allocation4], 4294967040 }
 0x2e3   :  { %460 = vsyncpa [#allocation3], 1 }
 0x2e4   :  { %461 = vsyncpa [#allocation6], 1 }
 0x2e5   :  { %462 = vsyncpa [#allocation9], 1 }
 0x2e6   :  { %463 = vsyncpa [#allocation12], 1 }
 0x2e7   :  { %464 = vsyncpa [#allocation4], 1 }

</bundles_post_ra>
